<compile_context>
chip_gen: v7x
topology: tpu7x:2x2x1
jax: 0.10.0
libtpu: 0.0.40
codegen_flags: <defaults>
</compile_context>

<pallas_src>
import functools

import jax
import jax.numpy as jnp
from jax.experimental import pallas as pl
from jax.experimental.pallas import tpu as pltpu


def _round_up(x: int, m: int) -> int:
    return ((x + m - 1) // m) * m


def _choose_row_tile(M: int, tm: int, min_steps: int = 2) -> int:
    """Row tile: multiple of 8, <= requested tm, and small enough that the
    grid has >= min_steps steps (so both v7x TensorCores get work)."""
    if M <= 8:
        return M                      # single block equal to the row extent
    tm_req = max(8, _round_up(min(tm, M), 8))
    cap = _round_up(pl.cdiv(M, min_steps), 8)
    return max(8, min(tm_req, cap))


def _patch_embed_kernel(a_ref, w_ref, b_ref, o_ref):
    # a_ref: (tm, Kp) bf16 patch rows, w_ref: (Kp, Np) bf16 projection,
    # b_ref: (1, Np) f32 bias.  Accumulate in f32 on the MXU, bias add in f32,
    # cast only on the store.
    acc = jnp.dot(a_ref[...], w_ref[...], preferred_element_type=jnp.float32)
    o_ref[...] = (acc + b_ref[...]).astype(o_ref.dtype)


def patch_embed_matmul(patches, weight, bias, *, tm=1024, out_dtype=jnp.float32):
    """patches: (M, K), weight: (K, N), bias: (N,) -> (M, N) in out_dtype."""
    M, K = patches.shape
    Kw, N = weight.shape
    assert K == Kw and bias.shape == (N,)

    # Lane-dense K: pad the contraction dim to a multiple of 128 (dense vld,
    # full MXU passes).  Real ViT dims (768) are a no-op.
    k_pad = _round_up(K, 128)
    if k_pad != K:
        patches = jnp.pad(patches, ((0, 0), (0, k_pad - K)))
        weight = jnp.pad(weight, ((0, k_pad - K), (0, 0)))

    # Lane-dense output: pad the embed dim to a multiple of 128 (unmasked vst).
    n_pad = _round_up(N, 128)
    if n_pad != N:
        weight = jnp.pad(weight, ((0, 0), (0, n_pad - N)))
        bias = jnp.pad(bias, (0, n_pad - N))
    bias2d = bias.astype(jnp.float32).reshape(1, n_pad)

    # Row tiling: no row padding -- grid uses cdiv and Pallas masks the
    # partial last block's stores.
    tm_eff = _choose_row_tile(M, tm)
    grid = (pl.cdiv(M, tm_eff),)

    bpe_in = patches.dtype.itemsize
    bpe_w = weight.dtype.itemsize
    bpe_out = jnp.dtype(out_dtype).itemsize

    # Double-buffered VMEM footprint.  Weight / bias have constant index_maps
    # so they are only fetched once, but budget 2x buffers anyway.
    vmem_bytes = (2 * tm_eff * k_pad * bpe_in
                  + 2 * k_pad * n_pad * bpe_w
                  + 2 * n_pad * 4
                  + 2 * tm_eff * n_pad * bpe_out)
    # Clamp at 48 MiB: leaves headroom on v7x (64 MiB physical VMEM) and is
    # well above the old 32 MiB cap that throttled large tiles on v5e/v6e.
    vmem_limit = int(min(max(2 * vmem_bytes, 4 << 20), 48 << 20))

    cost = pl.CostEstimate(
        flops=2 * M * k_pad * n_pad,
        transcendentals=0,
        bytes_accessed=(M * k_pad * bpe_in + k_pad * n_pad * bpe_w
                        + n_pad * 4 + M * n_pad * bpe_out),
    )

    out = pl.pallas_call(
        _patch_embed_kernel,
        out_shape=jax.ShapeDtypeStruct((M, n_pad), out_dtype),
        grid_spec=pltpu.PrefetchScalarGridSpec(
            num_scalar_prefetch=0,
            grid=grid,
            in_specs=[
                pl.BlockSpec((tm_eff, k_pad), lambda i: (i, 0)),
                pl.BlockSpec((k_pad, n_pad), lambda i: (0, 0)),
                pl.BlockSpec((1, n_pad), lambda i: (0, 0)),
            ],
            out_specs=pl.BlockSpec((tm_eff, n_pad), lambda i: (i, 0)),
        ),
        compiler_params=pltpu.CompilerParams(
            dimension_semantics=("parallel",),
            # Let XLA fuse the patch-extraction cast/transpose/reshape into the
            # input DMA of the patch matrix instead of an extra HBM round trip.
            allow_input_fusion=[True, False, False],
            vmem_limit_bytes=vmem_limit,
        ),
        cost_estimate=cost,
    )(patches, weight, bias2d)

    # Strip lane padding only (no row padding to strip).  No-op for ViT dims.
    if n_pad != N:
        out = out[:, :N]
    return out


def prepare_patch_embed_params(conv_w, conv_b, *, compute_dtype=jnp.bfloat16):
    """One-time weight prep (hoisted out of the forward path).

    conv_w: (E, C, ph, pw) -> (K, E) in the MXU dtype; conv_b -> f32.
    """
    E, C, ph, pw = conv_w.shape
    w2d = conv_w.reshape(E, C * ph * pw).T.astype(compute_dtype)   # (K, E)
    bias = conv_b.astype(jnp.float32)
    return w2d, bias


def patch_embed_forward(x, w2d, bias, *, patch_size,
                        compute_dtype=jnp.bfloat16, tm=1024, out_dtype=None):
    """Equivalent of PatchEmbed.forward.

    x: (B, C, H, W); w2d: (C*ph*pw, E) from prepare_patch_embed_params;
    bias: (E,) f32.  Returns (B, num_patches, E).

    out_dtype: dtype of the stored result (default: x.dtype, matching the
    PyTorch module).  Pass jnp.bfloat16 when the consumer is bf16 -- the f32
    output is the single largest HBM term of this mem-bound kernel.
    """
    B, C, H, W = x.shape
    ph, pw = patch_size
    K, E = w2d.shape
    assert K == C * ph * pw
    assert H % ph == 0 and W % pw == 0, "image size must match patch grid"
    Hp, Wp = H // ph, W // pw
    num_patches = Hp * Wp
    if out_dtype is None:
        out_dtype = x.dtype

    # Cast to the MXU dtype *before* extraction (halves the bytes the
    # transpose moves); flatten each patch in (C, ph, pw) order to match the
    # PyTorch conv weight flattening.
    xc = x.astype(compute_dtype)
    xp = xc.reshape(B, C, Hp, ph, Wp, pw)
    xp = jnp.transpose(xp, (0, 2, 4, 1, 3, 5))            # (B, Hp, Wp, C, ph, pw)
    patches = xp.reshape(B * num_patches, K)              # (M, K)

    out = patch_embed_matmul(patches, w2d, bias, tm=tm, out_dtype=out_dtype)
    return out.reshape(B, num_patches, E)


if __name__ == "__main__":
    # Small shapes consistent with the module: img=16, patch=4, C=4, E=32.
    B, C, H, W = 2, 4, 16, 16
    ph = pw = 4
    E = 32

    key = jax.random.PRNGKey(0)
    kx, kw, kb = jax.random.split(key, 3)
    x = jax.random.normal(kx, (B, C, H, W), dtype=jnp.float32)
    conv_w = jax.random.normal(kw, (E, C, ph, pw), dtype=jnp.float32) * 0.02
    conv_b = jax.random.normal(kb, (E,), dtype=jnp.float32) * 0.02

    # One-time weight prep outside the jitted forward.
    w2d, bias = prepare_patch_embed_params(conv_w, conv_b)

    fwd = jax.jit(functools.partial(patch_embed_forward, patch_size=(ph, pw)))
    out = jax.block_until_ready(fwd(x, w2d, bias))

    # Reference: strided conv on the same bf16-rounded inputs (the kernel runs
    # the MXU in bf16 with f32 accumulation), f32 accumulate, then
    # flatten(2).transpose(1, 2).
    x_r = x.astype(jnp.bfloat16).astype(jnp.float32)
    w_r = conv_w.astype(jnp.bfloat16).astype(jnp.float32)
    ref = jax.lax.conv_general_dilated(
        x_r, w_r, window_strides=(ph, pw), padding="VALID",
        dimension_numbers=("NCHW", "OIHW", "NCHW"),
        precision=jax.lax.Precision.HIGHEST)
    ref = ref + conv_b.reshape(1, E, 1, 1)
    ref = ref.reshape(B, E, -1).transpose(0, 2, 1)

    assert out.shape == (B, (H // ph) * (W // pw), E)
    assert jnp.allclose(out, ref, atol=2e-3, rtol=2e-3), (
        float(jnp.max(jnp.abs(out - ref))))
    print("KERNEL_OK")
</pallas_src>

<mosaic_0001>
module attributes {stable_mosaic.version = 11 : i64} {
  func.func @_patch_embed_kernel(%arg0: i32, %arg1: memref<16x128xbf16, #tpu.memory_space<vmem>>, %arg2: memref<128x128xbf16, #tpu.memory_space<vmem>>, %arg3: memref<1x128xf32, #tpu.memory_space<vmem>>, %arg4: memref<16x128xf32, #tpu.memory_space<vmem>>) attributes {dimension_semantics = [#tpu.dimension_semantics<parallel>], iteration_bounds = array<i64: 2>, scalar_prefetch = 0 : i64, scratch_operands = 0 : i64, tpu.core_type = #tpu.core_type<tc>, window_params = [{transform_indices = @transform_0, window_bounds = array<i64: 16, 128>}, {pipeline_mode = #tpu.pipeline_mode<synchronous>, transform_indices = @transform_1, window_bounds = array<i64: 128, 128>}, {pipeline_mode = #tpu.pipeline_mode<synchronous>, transform_indices = @transform_2, window_bounds = array<i64: 1, 128>}, {transform_indices = @transform_3, window_bounds = array<i64: 16, 128>}]} {
    %c0 = arith.constant 0 : index
    %c0_0 = arith.constant 0 : index
    %0 = vector.load %arg1[%c0, %c0_0] : memref<16x128xbf16, #tpu.memory_space<vmem>>, vector<16x128xbf16>
    %c0_1 = arith.constant 0 : index
    %c0_2 = arith.constant 0 : index
    %1 = vector.load %arg2[%c0_1, %c0_2] : memref<128x128xbf16, #tpu.memory_space<vmem>>, vector<128x128xbf16>
    %cst = arith.constant dense<0.000000e+00> : vector<16x128xf32>
    %2 = tpu.matmul %0, %1, %cst {dimension_numbers = #tpu.dot_dimension_numbers<[1], [0], [0], [1], [0, 0, 1, 1], [], []>} : vector<16x128xbf16>, vector<128x128xbf16>, vector<16x128xf32> -> vector<16x128xf32>
    %c0_3 = arith.constant 0 : index
    %c0_4 = arith.constant 0 : index
    %3 = vector.load %arg3[%c0_3, %c0_4] : memref<1x128xf32, #tpu.memory_space<vmem>>, vector<1x128xf32>
    %4 = vector.broadcast %3 : vector<1x128xf32> to vector<16x128xf32>
    %5 = arith.addf %2, %4 : vector<16x128xf32>
    %c0_5 = arith.constant 0 : index
    %c0_6 = arith.constant 0 : index
    %6 = vector.load %arg4[%c0_5, %c0_6] : memref<16x128xf32, #tpu.memory_space<vmem>>, vector<16x128xf32>
    tpu.vector_store %arg4[%c0_5, %c0_6], %5 {strides = array<i32>} : memref<16x128xf32, #tpu.memory_space<vmem>>, vector<16x128xf32>,
    return
  }
  func.func @transform_0(%arg0: i32) -> (i32, i32) {
    %c0_i32 = arith.constant 0 : i32
    %c0_i32_0 = arith.constant 0 : i32
    return %arg0, %c0_i32 : i32, i32
  }
  func.func @transform_1(%arg0: i32) -> (i32, i32) {
    %c0_i32 = arith.constant 0 : i32
    %c0_i32_0 = arith.constant 0 : i32
    %c0_i32_1 = arith.constant 0 : i32
    return %c0_i32, %c0_i32_0 : i32, i32
  }
  func.func @transform_2(%arg0: i32) -> (i32, i32) {
    %c0_i32 = arith.constant 0 : i32
    %c0_i32_0 = arith.constant 0 : i32
    %c0_i32_1 = arith.constant 0 : i32
    return %c0_i32, %c0_i32_0 : i32, i32
  }
  func.func @transform_3(%arg0: i32) -> (i32, i32) {
    %c0_i32 = arith.constant 0 : i32
    %c0_i32_0 = arith.constant 0 : i32
    return %arg0, %c0_i32 : i32, i32
  }
}

</mosaic_0001>

<bundles_post_ra>
// kernel: patch_embed_forward.2
= control target key start
LH: loop header
LB: loop body
LE: loop exit
PB: predicated region body
PF: predicated region fallthrough
CT: control target
= control target key end

     0   :  { %s754_s0 = inlined_call_operand.vmem [shape: bf16[128,128], index: 0, kind: input, shape index: {}]   ;;  %s755_s1 = inlined_call_operand.vmem [shape: f32[1,128], index: 1, kind: input, shape index: {}]   ;;  %s756_s2 = inlined_call_operand.vmem [shape: bf16[32,64], index: 2, kind: input, shape index: {}]   ;;  %s757_s3 = inlined_call_operand.<no memory space> [shape: bf16[], index: 3, kind: input, shape index: {}]   ;;  %s758_s4 = inlined_call_operand.hbm [shape: f32[32,128], index: 4, kind: output, shape index: {}]  }
   0x1   :  { %v9_v0 = vstv %s757_s3 }
   0x2   :  { %v621_v1 = vunpack.i.l.bf16 %v9_v0 }
   0x3   :  { %14 = vsyncpa [#allocation8], 0 }
   0x4   :  { %16 = vsyncpa [#allocation8 + $0x1], 0  ;;  %s623_s17 = smov 0   ;;  %s625_s18 = smov 0  }
   0x5   :  { %s627_s19 = smov 0   ;;  %s629_s20 = smov 0  }
   0x6 LB: > { %s644_s3 = sadd.s32 4294967295, %s586_s20   ;;  %s419_s21 = sadd.s32 4294967294, %s586_s20   ;;  %s586_s20 = sphi %s629_s20, %s764_s20   ;;  %s582_s19 = sphi %s627_s19, %s763_s19   ;;  %s578_s18 = sphi %s625_s18, %s762_s18   ;;  %s574_s17 = sphi %s623_s17, %s761_s17  }
   0x7   : > { %s648_s22 = sadd.s32 1, %s586_s20   ;;  %s97_s23 = sadd.s32 1, %s582_s19 }
   0x8   : > { %s94_s24 = ssub.s32 %s586_s20, %s648_s22  ;;  %p107_p0 = scmp.ne.s32.totalorder %s582_s19, %s578_s18 }
   0x9   : > { %p95_p1 = scmp.eq.s32.totalorder %s94_s24, 0  ;;  %p108_p2 = scmp.eq.s32.totalorder %s644_s3, 1 }
   0xa   : > { %p113_p3 = scmp.ne.s32.totalorder %s578_s18, %s574_s17  ;;  %p114_p4 = scmp.eq.s32.totalorder %s419_s21, 1 }
   0xb   : > { %s659_s25 = scalar_select %p95_p1, %s582_s19, %s97_s23  }
   0xc   : > { %p661_p5 = por %p108_p2, %p107_p0  ;;  %p665_p6 = por %p114_p4, %p113_p3 }
   0xd   : > { %p422_p7 = scmp.ge.s32.totalorder %s586_s20, 1  ;;  %p147_p8 = scmp.lt.s32.totalorder %s586_s20, 3 }
   0xf   : > { %p148_p9 = pnand %p422_p7, %p147_p8 }
  0x11   : > { %151 = sbr.rel (%p148_p9) target bundleno = 288 (0x120), region = 32 }
  0x18   : > { %v515_v2 = vld [vmem:[%s754_s0] sm:$0xff]   ;;  %v588_v3 = vmov 0.0   ;;  %v190_v4 = vlaneseq  ;;  %v516_v5 = vld [vmem:[%s754_s0 + $0x8] sm:$0xff]   ;;  %vm589_vm0 = vmmov 0   ;;  %s424_s6 = sshll.u32 %s644_s3, 1  ;;  %v517_v7 = vld [vmem:[%s754_s0 + $0x10] sm:$0xff]  }
  0x19   : > { %452 = vmatprep.subr.bf16.mxu0 %v588_v3  ;;  %468 = vmatprep.mubr.msk.bf16.mxu0 %vm589_vm0, %v588_v3  ;;  %p172_p10 = scmp.lt.s32.totalorder %s424_s6, 3  ;;  %v518_v9 = vld [vmem:[%s754_s0 + $0x18] sm:$0xff]   ;;  %v519_v16 = vld [vmem:[%s754_s0 + $0x20] sm:$0xff]   ;;  %v520_v17 = vld [vmem:[%s754_s0 + $0x28] sm:$0xff]   ;;  %s168_s5 = sand.u32 1, %s578_s18  }
  0x1a   : > { %453 = vmatpush3.bf16.msra.mxu0 %v515_v2  ;;  %v191_v6 = vand.u32 127, %v190_v4  ;;  %v521_v18 = vld [vmem:[%s754_s0 + $0x30] sm:$0xff]   ;;  %v522_v19 = vld [vmem:[%s754_s0 + $0x38] sm:$0xff]   ;;  %v427_v21 = vld [vmem:[%s755_s1] ss:$0 sm:$0xff]  ;;  %s442_s11 = sshll.u32 %s644_s3, 8 }
  0x1b   : > { %454 = vmatprep.subr.bf16.mxu0 %v588_v3  ;;  %s766_s6 = smov (!%p172_p10, %s424_s6), 3  ;;  %s711_s14 = scalar_lea.hbm %s758_s4, %s442_s11 }
  0x1c   : > { %s425_s9 = sshll.u32 %s766_s6, 2  ;;  %vm193_vm1 = vcmp.lt.s32.totalorder %v191_v6, 64  ;;  %s423_s6 = sshll.u32 %s168_s5, 4 }
  0x1d   : > { %s175_s12 = scalar_lea.vmem %s756_s2, %s425_s9  ;;  %s170_s9 = scalar_lea.vmem [#allocation7], %s423_s6 }
  0x1e   : > { %455 = vmatpush3.bf16.msra.mxu0 %v516_v5  ;;  %v187_v8 = vld [vmem:[%s175_s12] sm:$0xff]   ;;  %s357_s10 = sshll.u32 %s170_s9, 4  ;;  %s713_s15 = scalar_lea.sflag [#allocation8], %s168_s5  ;;  %s706_s10 = int_to_ptr.vmem [resolvable:$true] %s357_s10 }
  0x1f   : > { %456 = vmatprep.subr.bf16.mxu0 %v588_v3  ;;  %v188_v10 = vunpack.c.l.bf16 %v187_v8  ;;  %v209_v11 = vunpack.c.h.bf16 %v187_v8  ;;  %s524_s3 = scalar_lea.vmem %s706_s10, 256  ;;  %s590_s16 = smov [#allocation7]  }
  0x20   : > { %p525_p11 = scmp.ne.s32.totalorder %s706_s10, %s524_s3  ;;  %s528_s21 = sshll.u32 %s590_s16, 4  ;;  %s529_s21 = int_to_ptr.vmem [resolvable:$false] %s528_s21 }
  0x21   : > { %v194_v12 = vsel %vm193_vm1, %v188_v10, %v621_v1  ;;  %v215_v13 = vsel %vm193_vm1, %v209_v11, %v621_v1  ;;  %s530_s23 = scalar_lea.vmem %s529_s21, 512  ;;  %p531_p0 = scmp.lt.s32.totalorder %s706_s10, %s529_s21 }
  0x22   : > { %457 = vmatpush3.bf16.msra.mxu0 %v517_v7  ;;  %v195_v14 = vpack.c.bf16 %v588_v3, %v194_v12  ;;  %v217_v15 = vpack.c.bf16 %v588_v3, %v215_v13  ;;  %p526_p12 = pnand %p525_p11, %p661_p5  ;;  %p532_p1 = scmp.lt.s32.totalorder %s530_s23, %s524_s3 }
  0x23   : > { %458 = vmatprep.subr.bf16.mxu0 %v588_v3 }
  0x24   : > { %197 = vst [vmem:[#allocation9] sm:$0xf] %v195_v14  ;;  %219 = vst [vmem:[#allocation9 + $0x4] sm:$0xf] %v217_v15  ;;  %p527_p13 = pneg %p526_p12  ;;  %p533_p2 = por %p532_p1, %p531_p0 }
  0x26   : > { %459 = vmatpush3.bf16.msra.mxu0 %v518_v9  ;;  %p534_p3 = pnand %p533_p2, %p527_p13 }
  0x27   : > { %460 = vmatprep.subr.bf16.mxu0 %v588_v3 }
  0x2a   : > { %461 = vmatpush3.bf16.msra.mxu0 %v519_v16 }
  0x2b   : > { %462 = vmatprep.subr.bf16.mxu0 %v588_v3  ;;  %v523_v20 = vld [vmem:[#allocation9] sm:$0xff]  }
  0x2e   : > { %463 = vmatpush3.bf16.msra.mxu0 %v520_v17 }
  0x2f   : > { %464 = vmatprep.subr.bf16.mxu0 %v588_v3 }
  0x32   : > { %465 = vmatpush3.bf16.msra.mxu0 %v521_v18 }
  0x33   : > { %466 = vmatprep.subr.bf16.mxu0 %v588_v3 }
  0x36   : > { %467 = vmatpush3.bf16.msra.mxu0 %v522_v19 }
  0x39   : > { %469 = vmatmul.mubr.bf16.vlgmr.msra.gmra.mrb[0].mxu0 %v523_v20 }
 0x10c   : > { %v334_v22 = vpop.f32.mrb[0].mxu0 }
 0x10d   : > { %v335_v23 = vadd.f32 %v427_v21, %v334_v22  ;;  %v470_v24 = vpop.f32.mrb[1].mxu0 }
 0x10e   : > { %v337_v25 = vpop.f32.mrb[2].mxu0 }
 0x10f   : > { %341 = vst [vmem:[%s170_s9] sm:$0xff] %v335_v23  ;;  %v338_v26 = vadd.f32 %v427_v21, %v337_v25  ;;  %v471_v27 = vpop.f32.mrb[3].mxu0 }
 0x111   : > { %342 = vst [vmem:[%s170_s9 + $0x8] sm:$0xff] %v338_v26 }
 0x112   : > { %537 = shalt.err (!%p534_p3)
}
 0x113   : > { %s538_s24 = scalar_lea.hbm %s711_s14, 256  ;;  %s542_s30 = scalar_lea.hbm %s758_s4, 512 }
 0x114   : > { %p539_p4 = scmp.ne.s32.totalorder %s711_s14, %s538_s24  ;;  %p543_p9 = scmp.lt.u32.totalorder %s711_s14, %s758_s4 }
 0x115   : > { %p544_p10 = scmp.lt.u32.totalorder %s542_s30, %s538_s24  ;;  %p546_p12 = scmp.lt.u32.totalorder %s538_s24, %s711_s14 }
 0x116   : > { %p540_p7 = pnand %p539_p4, %p661_p5 }
 0x117   : > { %p545_p11 = por %p544_p10, %p543_p9 }
 0x118   : > { %p541_p8 = pneg %p540_p7 }
 0x119   : > { %p547_p13 = por %p546_p12, %p545_p11 }
 0x11b   : > { %p548_p0 = pnand %p547_p13, %p541_p8 }
 0x11d   : > { %551 = shalt.err (!%p548_p0)
}
 0x11e   : > { %s591_s7 = smov 128   ;;  %s592_s8 = smov 8  }
 0x11f   : > { %472 = dma.vmem_to_hbm [thread:$0]  (%p661_p5), %s706_s10, 256, %s711_s14, %s713_s15, %s591_s7, %s591_s7, %s592_s8  }
 0x120 PF: > { %p478_p1 = scmp.ge.s32.totalorder %s586_s20, 2  ;;  %s372_s9 = sand.u32 1, %s574_s17  }
 0x121   : > { %s373_s11 = scalar_lea.sflag [#allocation8], %s372_s9 }
 0x122   : > { %p475_p2 = pnand %p478_p1, %p665_p6 }
 0x124   : > { %569 = dma.done.wait (!%p475_p2), %s373_s11, 256  }
 0x125   : > { %571 = vsyncadd (!%p475_p2), %s373_s11, 4294967040  ;;  %p19_p3 = scmp.ge.s32.totalorder %s648_s22, 4   ;;  %s761_s17 = smov %s578_s18 }
 0x126   : > { %s762_s18 = smov %s582_s19  ;;  %s763_s19 = smov %s659_s25 }
 0x127   : > { %s764_s20 = smov %s648_s22  ;;  %21 = sbr.rel (!%p19_p3) target bundleno = 6 (0x6), region = 69 }
 0x12e   :  { %378 = vsyncpa [#allocation8], 1 }
 0x12f   :  { %380 = vsyncpa [#allocation8 + $0x1], 1 }

</bundles_post_ra>
